<compile_context>
chip_gen: v7x
topology: tpu7x:2x2x1
jax: 0.10.0
libtpu: 0.0.40
codegen_flags: <defaults>
</compile_context>

<pallas_src>
import functools

import jax
import jax.numpy as jnp
from jax import lax
from jax.experimental import pallas as pl
from jax.experimental.pallas import tpu as pltpu

HIDDEN = 256
OUT = 2  # [mu, std]


def _elementwise_dtype():
    """bf16 elementwise on v6e/v7x (bf16 VPU/EUP); f32 on v5e and older."""
    try:
        kind = jax.devices()[0].device_kind.lower()
    except Exception:
        return jnp.float32
    if ("v6" in kind) or ("v7" in kind) or ("7x" in kind):
        return jnp.bfloat16
    return jnp.float32


def _gelu(x):
    # tanh-approximate GELU; cubic re-associated to save a multiply.
    c = 0.7978845608028654       # sqrt(2/pi)
    c3 = 0.03567740813636141     # c * 0.044715
    return 0.5 * x * (1.0 + jnp.tanh(x * (c + c3 * (x * x))))


def _softplus(x):
    # numerically stable log(1 + exp(x)) (torch softplus, beta=1)
    return jnp.maximum(x, 0.0) + jnp.log(1.0 + jnp.exp(-jnp.abs(x)))


def critic_kernel(s_ref, a_ref,
                  w1s_ref, w1a_ref, b1_ref,
                  w2_ref, b2_ref,
                  w3_ref, b3_ref,
                  w4_ref, b4_ref,
                  w5_ref, b5_ref,
                  o_ref, *, elem_dtype):
    bf16 = jnp.bfloat16
    f32 = jnp.float32

    s = s_ref[...].astype(bf16)            # (TM, D)
    a = a_ref[...].astype(elem_dtype)      # (TM, 1)

    # layer 1: dot(s, W1[:D]) on the MXU + rank-1 action term on the VPU
    h = jnp.dot(s, w1s_ref[...], preferred_element_type=f32).astype(elem_dtype)
    h = _gelu(h
              + a * w1a_ref[...].astype(elem_dtype)
              + b1_ref[...].astype(elem_dtype))

    # hidden layers 2..4 (bf16 MXU, f32 accum, elementwise in elem_dtype)
    for w_ref, b_ref in ((w2_ref, b2_ref), (w3_ref, b3_ref), (w4_ref, b4_ref)):
        h = jnp.dot(h.astype(bf16), w_ref[...], preferred_element_type=f32)
        h = _gelu(h.astype(elem_dtype) + b_ref[...].astype(elem_dtype))

    # head: 2 lanes wide -> negligible VALU, keep epilogue math in f32
    o = jnp.dot(h.astype(bf16), w5_ref[...], preferred_element_type=f32)
    o = _gelu(o + b5_ref[...])             # (TM, 2) f32

    # column 0 -> mu (unchanged), column 1 -> softplus(std); one dense store
    lane = lax.broadcasted_iota(jnp.int32, o.shape, 1)
    o_ref[...] = jnp.where(lane == 0, o, _softplus(o))


def prepare_params(params, latent_dim):
    """Hoist the per-call weight casts/splits out of the forward path."""
    D = latent_dim
    w1 = params["w1"]
    prepped = {
        "w1s": w1[:D].astype(jnp.bfloat16),          # (D, 256) bf16 (MXU)
        "w1a": w1[D:D + 1].astype(jnp.float32),      # (1, 256) f32 (rank-1 term)
        "b1": params["b1"].astype(jnp.float32),
    }
    for i in (2, 3, 4, 5):
        prepped[f"w{i}"] = params[f"w{i}"].astype(jnp.bfloat16)
        prepped[f"b{i}"] = params[f"b{i}"].astype(jnp.float32)
    return prepped


@functools.partial(jax.jit, static_argnames=("tm",))
def critic_forward(s, a, prepped, *, tm=2048):
    """s: (B, A, latent_dim), a: (B, A, 1).  Returns (mu, log_std), each
    (B, A, 1) float32 — same semantics as the PyTorch module."""
    B, A, D = s.shape
    M = B * A
    s2 = s.reshape(M, D).astype(jnp.float32)
    a2 = a.reshape(M, 1).astype(jnp.float32)

    # Row tile: big enough to amortize ~0.35us/step grid overhead; for
    # moderate M split into >=2 blocks so both v7x TensorCores get work.
    if M >= 2 * tm:
        TM = tm
    else:
        TM = min(tm, max(8, (((M + 1) // 2 + 7) // 8) * 8))
    n_blocks = pl.cdiv(M, TM)
    M_pad = n_blocks * TM
    if M_pad != M:
        s2 = jnp.pad(s2, ((0, M_pad - M), (0, 0)))
        a2 = jnp.pad(a2, ((0, M_pad - M), (0, 0)))

    elem = _elementwise_dtype()

    row = lambda shape: pl.BlockSpec(shape, lambda i: (i, 0))
    const = lambda shape: pl.BlockSpec(shape, lambda i: (0, 0))

    weight_mults = D * HIDDEN + 3 * HIDDEN * HIDDEN + HIDDEN * OUT
    cost = pl.CostEstimate(
        flops=2 * M_pad * weight_mults,
        transcendentals=M_pad * (4 * HIDDEN + 2 * OUT),
        bytes_accessed=(M_pad * (D + 1 + OUT) * 4        # activations in/out
                        + weight_mults * 2               # bf16 weights
                        + (5 * HIDDEN + OUT + HIDDEN) * 4),
    )

    out = pl.pallas_call(
        functools.partial(critic_kernel, elem_dtype=elem),
        out_shape=jax.ShapeDtypeStruct((M_pad, OUT), jnp.float32),
        grid=(n_blocks,),
        in_specs=[
            row((TM, D)),            # s tile
            row((TM, 1)),            # a tile
            const((D, HIDDEN)),      # w1[:D]      (bf16)
            const((1, HIDDEN)),      # w1[D:D+1]   (f32)
            const((1, HIDDEN)),      # b1
            const((HIDDEN, HIDDEN)), const((1, HIDDEN)),   # w2, b2
            const((HIDDEN, HIDDEN)), const((1, HIDDEN)),   # w3, b3
            const((HIDDEN, HIDDEN)), const((1, HIDDEN)),   # w4, b4
            const((HIDDEN, OUT)),    const((1, OUT)),      # w5, b5
        ],
        out_specs=row((TM, OUT)),
        compiler_params=pltpu.CompilerParams(
            dimension_semantics=("parallel",),
            vmem_limit_bytes=32 * 1024 * 1024,   # ample up to TM=4096, v7x-safe
        ),
        cost_estimate=cost,
    )(s2, a2, prepped["w1s"], prepped["w1a"], prepped["b1"],
      prepped["w2"], prepped["b2"], prepped["w3"], prepped["b3"],
      prepped["w4"], prepped["b4"], prepped["w5"], prepped["b5"])

    out = out[:M]
    mu = out[:, 0:1].reshape(B, A, 1)
    log_std = out[:, 1:2].reshape(B, A, 1)
    return mu, log_std


def init_params(key, latent_dim):
    """Deterministic nn.Linear-style (uniform +/- 1/sqrt(fan_in)) init."""
    dims = [(latent_dim + 1, HIDDEN), (HIDDEN, HIDDEN), (HIDDEN, HIDDEN),
            (HIDDEN, HIDDEN), (HIDDEN, OUT)]
    params = {}
    keys = jax.random.split(key, 2 * len(dims))
    for i, (fan_in, fan_out) in enumerate(dims):
        bound = 1.0 / jnp.sqrt(float(fan_in))
        params[f"w{i + 1}"] = jax.random.uniform(
            keys[2 * i], (fan_in, fan_out), jnp.float32, -bound, bound)
        params[f"b{i + 1}"] = jax.random.uniform(
            keys[2 * i + 1], (1, fan_out), jnp.float32, -bound, bound)
    return params


def _reference_kernel_math(s, a, params, elem):
    """Pure-JAX reference mirroring the kernel's dtype/approximation strategy."""
    B, A, D = s.shape
    M = B * A
    s2 = s.reshape(M, D).astype(jnp.bfloat16)
    a2 = a.reshape(M, 1).astype(elem)
    w1 = params["w1"]
    h = jnp.dot(s2, w1[:D].astype(jnp.bfloat16),
                preferred_element_type=jnp.float32).astype(elem)
    h = _gelu(h + a2 * w1[D:D + 1].astype(elem) + params["b1"].astype(elem))
    for i in (2, 3, 4):
        h = jnp.dot(h.astype(jnp.bfloat16), params[f"w{i}"].astype(jnp.bfloat16),
                    preferred_element_type=jnp.float32)
        h = _gelu(h.astype(elem) + params[f"b{i}"].astype(elem))
    o = jnp.dot(h.astype(jnp.bfloat16), params["w5"].astype(jnp.bfloat16),
                preferred_element_type=jnp.float32)
    o = _gelu(o + params["b5"].astype(jnp.float32))
    mu = o[:, 0:1].astype(jnp.float32).reshape(B, A, 1)
    log_std = _softplus(o[:, 1:2].astype(jnp.float32)).reshape(B, A, 1)
    return mu, log_std


def _reference_torch_parity(s, a, params):
    """f32 / erf-GELU reference matching the PyTorch module's math exactly."""
    def erf_gelu(x):
        return 0.5 * x * (1.0 + lax.erf(x * 0.7071067811865476))
    B, A, D = s.shape
    x = jnp.concatenate([s, a], axis=-1).reshape(B * A, D + 1).astype(jnp.float32)
    h = x
    for i in (1, 2, 3, 4, 5):
        h = erf_gelu(h @ params[f"w{i}"] + params[f"b{i}"])
    mu = h[:, 0:1].reshape(B, A, 1)
    log_std = jax.nn.softplus(h[:, 1:2]).reshape(B, A, 1)
    return mu, log_std


if __name__ == "__main__":
    key = jax.random.PRNGKey(0)
    B, A, LATENT = 2, 4, 16  # batch_dim, asset_dim, latent_dim

    k_s, k_a, k_p = jax.random.split(key, 3)
    s = jax.random.normal(k_s, (B, A, LATENT), jnp.float32)
    a = jax.random.normal(k_a, (B, A, 1), jnp.float32)
    params = init_params(k_p, LATENT)
    prepped = prepare_params(params, LATENT)     # casts hoisted out of forward

    mu, log_std = jax.block_until_ready(critic_forward(s, a, prepped))

    assert mu.shape == (B, A, 1) and log_std.shape == (B, A, 1)

    # 1) tight check vs a reference using the kernel's own math strategy
    elem = _elementwise_dtype()
    mu_k, ls_k = _reference_kernel_math(s, a, params, elem)
    assert jnp.allclose(mu, mu_k, atol=1e-2, rtol=1e-2)
    assert jnp.allclose(log_std, ls_k, atol=1e-2, rtol=1e-2)

    # 2) loose parity check vs the exact f32 / erf-GELU PyTorch semantics
    mu_t, ls_t = _reference_torch_parity(s, a, params)
    assert jnp.allclose(mu, mu_t, atol=5e-2, rtol=5e-2)
    assert jnp.allclose(log_std, ls_t, atol=5e-2, rtol=5e-2)

    print("KERNEL_OK")
</pallas_src>

<mosaic_0001>
module attributes {stable_mosaic.version = 11 : i64} {
  func.func @critic_kernel(%arg0: i32, %arg1: memref<8x16xf32, #tpu.memory_space<vmem>>, %arg2: memref<8x1xf32, #tpu.memory_space<vmem>>, %arg3: memref<16x256xbf16, #tpu.memory_space<vmem>>, %arg4: memref<1x256xf32, #tpu.memory_space<vmem>>, %arg5: memref<1x256xf32, #tpu.memory_space<vmem>>, %arg6: memref<256x256xbf16, #tpu.memory_space<vmem>>, %arg7: memref<1x256xf32, #tpu.memory_space<vmem>>, %arg8: memref<256x256xbf16, #tpu.memory_space<vmem>>, %arg9: memref<1x256xf32, #tpu.memory_space<vmem>>, %arg10: memref<256x256xbf16, #tpu.memory_space<vmem>>, %arg11: memref<1x256xf32, #tpu.memory_space<vmem>>, %arg12: memref<256x2xbf16, #tpu.memory_space<vmem>>, %arg13: memref<1x2xf32, #tpu.memory_space<vmem>>, %arg14: memref<8x2xf32, #tpu.memory_space<vmem>>) attributes {dimension_semantics = [#tpu.dimension_semantics<parallel>], iteration_bounds = array<i64: 1>, scalar_prefetch = 0 : i64, scratch_operands = 0 : i64, tpu.core_type = #tpu.core_type<tc>, window_params = [{transform_indices = @transform_0, window_bounds = array<i64: 8, 16>}, {transform_indices = @transform_1, window_bounds = array<i64: 8, 1>}, {pipeline_mode = #tpu.pipeline_mode<synchronous>, transform_indices = @transform_2, window_bounds = array<i64: 16, 256>}, {pipeline_mode = #tpu.pipeline_mode<synchronous>, transform_indices = @transform_3, window_bounds = array<i64: 1, 256>}, {pipeline_mode = #tpu.pipeline_mode<synchronous>, transform_indices = @transform_4, window_bounds = array<i64: 1, 256>}, {pipeline_mode = #tpu.pipeline_mode<synchronous>, transform_indices = @transform_5, window_bounds = array<i64: 256, 256>}, {pipeline_mode = #tpu.pipeline_mode<synchronous>, transform_indices = @transform_6, window_bounds = array<i64: 1, 256>}, {pipeline_mode = #tpu.pipeline_mode<synchronous>, transform_indices = @transform_7, window_bounds = array<i64: 256, 256>}, {pipeline_mode = #tpu.pipeline_mode<synchronous>, transform_indices = @transform_8, window_bounds = array<i64: 1, 256>}, {pipeline_mode = #tpu.pipeline_mode<synchronous>, transform_indices = @transform_9, window_bounds = array<i64: 256, 256>}, {pipeline_mode = #tpu.pipeline_mode<synchronous>, transform_indices = @transform_10, window_bounds = array<i64: 1, 256>}, {pipeline_mode = #tpu.pipeline_mode<synchronous>, transform_indices = @transform_11, window_bounds = array<i64: 256, 2>}, {pipeline_mode = #tpu.pipeline_mode<synchronous>, transform_indices = @transform_12, window_bounds = array<i64: 1, 2>}, {transform_indices = @transform_13, window_bounds = array<i64: 8, 2>}]} {
    %c0 = arith.constant 0 : index
    %c0_0 = arith.constant 0 : index
    %0 = vector.load %arg1[%c0, %c0_0] : memref<8x16xf32, #tpu.memory_space<vmem>>, vector<8x16xf32>
    %1 = arith.truncf %0 : vector<8x16xf32> to vector<8x16xbf16>
    %c0_1 = arith.constant 0 : index
    %c0_2 = arith.constant 0 : index
    %2 = vector.load %arg2[%c0_1, %c0_2] : memref<8x1xf32, #tpu.memory_space<vmem>>, vector<8x1xf32>
    %c0_3 = arith.constant 0 : index
    %c0_4 = arith.constant 0 : index
    %3 = vector.load %arg3[%c0_3, %c0_4] : memref<16x256xbf16, #tpu.memory_space<vmem>>, vector<16x256xbf16>
    %cst = arith.constant dense<0.000000e+00> : vector<8x256xf32>
    %4 = tpu.matmul %1, %3, %cst {dimension_numbers = #tpu.dot_dimension_numbers<[1], [0], [0], [1], [0, 0, 1, 1], [], []>} : vector<8x16xbf16>, vector<16x256xbf16>, vector<8x256xf32> -> vector<8x256xf32>
    %c0_5 = arith.constant 0 : index
    %c0_6 = arith.constant 0 : index
    %5 = vector.load %arg4[%c0_5, %c0_6] : memref<1x256xf32, #tpu.memory_space<vmem>>, vector<1x256xf32>
    %6 = vector.broadcast %2 : vector<8x1xf32> to vector<8x256xf32>
    %7 = vector.broadcast %5 : vector<1x256xf32> to vector<8x256xf32>
    %8 = arith.mulf %6, %7 : vector<8x256xf32>
    %9 = arith.addf %4, %8 : vector<8x256xf32>
    %c0_7 = arith.constant 0 : index
    %c0_8 = arith.constant 0 : index
    %10 = vector.load %arg5[%c0_7, %c0_8] : memref<1x256xf32, #tpu.memory_space<vmem>>, vector<1x256xf32>
    %11 = vector.broadcast %10 : vector<1x256xf32> to vector<8x256xf32>
    %12 = arith.addf %9, %11 : vector<8x256xf32>
    %cst_9 = arith.constant 5.000000e-01 : f32
    %13 = vector.broadcast %cst_9 : f32 to vector<8x256xf32>
    %14 = arith.mulf %13, %12 : vector<8x256xf32>
    %15 = arith.mulf %12, %12 : vector<8x256xf32>
    %cst_10 = arith.constant 0.0356774069 : f32
    %16 = vector.broadcast %cst_10 : f32 to vector<8x256xf32>
    %17 = arith.mulf %16, %15 : vector<8x256xf32>
    %cst_11 = arith.constant 0.797884583 : f32
    %18 = vector.broadcast %cst_11 : f32 to vector<8x256xf32>
    %19 = arith.addf %18, %17 : vector<8x256xf32>
    %20 = arith.mulf %12, %19 : vector<8x256xf32>
    %21 = math.tanh %20 : vector<8x256xf32>
    %cst_12 = arith.constant 1.000000e+00 : f32
    %22 = vector.broadcast %cst_12 : f32 to vector<8x256xf32>
    %23 = arith.addf %22, %21 : vector<8x256xf32>
    %24 = arith.mulf %14, %23 : vector<8x256xf32>
    %25 = arith.truncf %24 : vector<8x256xf32> to vector<8x256xbf16>
    %c0_13 = arith.constant 0 : index
    %c0_14 = arith.constant 0 : index
    %26 = vector.load %arg6[%c0_13, %c0_14] : memref<256x256xbf16, #tpu.memory_space<vmem>>, vector<256x256xbf16>
    %cst_15 = arith.constant dense<0.000000e+00> : vector<8x256xf32>
    %27 = tpu.matmul %25, %26, %cst_15 {dimension_numbers = #tpu.dot_dimension_numbers<[1], [0], [0], [1], [0, 0, 1, 1], [], []>} : vector<8x256xbf16>, vector<256x256xbf16>, vector<8x256xf32> -> vector<8x256xf32>
    %c0_16 = arith.constant 0 : index
    %c0_17 = arith.constant 0 : index
    %28 = vector.load %arg7[%c0_16, %c0_17] : memref<1x256xf32, #tpu.memory_space<vmem>>, vector<1x256xf32>
    %29 = vector.broadcast %28 : vector<1x256xf32> to vector<8x256xf32>
    %30 = arith.addf %27, %29 : vector<8x256xf32>
    %cst_18 = arith.constant 5.000000e-01 : f32
    %31 = vector.broadcast %cst_18 : f32 to vector<8x256xf32>
    %32 = arith.mulf %31, %30 : vector<8x256xf32>
    %33 = arith.mulf %30, %30 : vector<8x256xf32>
    %cst_19 = arith.constant 0.0356774069 : f32
    %34 = vector.broadcast %cst_19 : f32 to vector<8x256xf32>
    %35 = arith.mulf %34, %33 : vector<8x256xf32>
    %cst_20 = arith.constant 0.797884583 : f32
    %36 = vector.broadcast %cst_20 : f32 to vector<8x256xf32>
    %37 = arith.addf %36, %35 : vector<8x256xf32>
    %38 = arith.mulf %30, %37 : vector<8x256xf32>
    %39 = math.tanh %38 : vector<8x256xf32>
    %cst_21 = arith.constant 1.000000e+00 : f32
    %40 = vector.broadcast %cst_21 : f32 to vector<8x256xf32>
    %41 = arith.addf %40, %39 : vector<8x256xf32>
    %42 = arith.mulf %32, %41 : vector<8x256xf32>
    %43 = arith.truncf %42 : vector<8x256xf32> to vector<8x256xbf16>
    %c0_22 = arith.constant 0 : index
    %c0_23 = arith.constant 0 : index
    %44 = vector.load %arg8[%c0_22, %c0_23] : memref<256x256xbf16, #tpu.memory_space<vmem>>, vector<256x256xbf16>
    %cst_24 = arith.constant dense<0.000000e+00> : vector<8x256xf32>
    %45 = tpu.matmul %43, %44, %cst_24 {dimension_numbers = #tpu.dot_dimension_numbers<[1], [0], [0], [1], [0, 0, 1, 1], [], []>} : vector<8x256xbf16>, vector<256x256xbf16>, vector<8x256xf32> -> vector<8x256xf32>
    %c0_25 = arith.constant 0 : index
    %c0_26 = arith.constant 0 : index
    %46 = vector.load %arg9[%c0_25, %c0_26] : memref<1x256xf32, #tpu.memory_space<vmem>>, vector<1x256xf32>
    %47 = vector.broadcast %46 : vector<1x256xf32> to vector<8x256xf32>
    %48 = arith.addf %45, %47 : vector<8x256xf32>
    %cst_27 = arith.constant 5.000000e-01 : f32
    %49 = vector.broadcast %cst_27 : f32 to vector<8x256xf32>
    %50 = arith.mulf %49, %48 : vector<8x256xf32>
    %51 = arith.mulf %48, %48 : vector<8x256xf32>
    %cst_28 = arith.constant 0.0356774069 : f32
    %52 = vector.broadcast %cst_28 : f32 to vector<8x256xf32>
    %53 = arith.mulf %52, %51 : vector<8x256xf32>
    %cst_29 = arith.constant 0.797884583 : f32
    %54 = vector.broadcast %cst_29 : f32 to vector<8x256xf32>
    %55 = arith.addf %54, %53 : vector<8x256xf32>
    %56 = arith.mulf %48, %55 : vector<8x256xf32>
    %57 = math.tanh %56 : vector<8x256xf32>
    %cst_30 = arith.constant 1.000000e+00 : f32
    %58 = vector.broadcast %cst_30 : f32 to vector<8x256xf32>
    %59 = arith.addf %58, %57 : vector<8x256xf32>
    %60 = arith.mulf %50, %59 : vector<8x256xf32>
    %61 = arith.truncf %60 : vector<8x256xf32> to vector<8x256xbf16>
    %c0_31 = arith.constant 0 : index
    %c0_32 = arith.constant 0 : index
    %62 = vector.load %arg10[%c0_31, %c0_32] : memref<256x256xbf16, #tpu.memory_space<vmem>>, vector<256x256xbf16>
    %cst_33 = arith.constant dense<0.000000e+00> : vector<8x256xf32>
    %63 = tpu.matmul %61, %62, %cst_33 {dimension_numbers = #tpu.dot_dimension_numbers<[1], [0], [0], [1], [0, 0, 1, 1], [], []>} : vector<8x256xbf16>, vector<256x256xbf16>, vector<8x256xf32> -> vector<8x256xf32>
    %c0_34 = arith.constant 0 : index
    %c0_35 = arith.constant 0 : index
    %64 = vector.load %arg11[%c0_34, %c0_35] : memref<1x256xf32, #tpu.memory_space<vmem>>, vector<1x256xf32>
    %65 = vector.broadcast %64 : vector<1x256xf32> to vector<8x256xf32>
    %66 = arith.addf %63, %65 : vector<8x256xf32>
    %cst_36 = arith.constant 5.000000e-01 : f32
    %67 = vector.broadcast %cst_36 : f32 to vector<8x256xf32>
    %68 = arith.mulf %67, %66 : vector<8x256xf32>
    %69 = arith.mulf %66, %66 : vector<8x256xf32>
    %cst_37 = arith.constant 0.0356774069 : f32
    %70 = vector.broadcast %cst_37 : f32 to vector<8x256xf32>
    %71 = arith.mulf %70, %69 : vector<8x256xf32>
    %cst_38 = arith.constant 0.797884583 : f32
    %72 = vector.broadcast %cst_38 : f32 to vector<8x256xf32>
    %73 = arith.addf %72, %71 : vector<8x256xf32>
    %74 = arith.mulf %66, %73 : vector<8x256xf32>
    %75 = math.tanh %74 : vector<8x256xf32>
    %cst_39 = arith.constant 1.000000e+00 : f32
    %76 = vector.broadcast %cst_39 : f32 to vector<8x256xf32>
    %77 = arith.addf %76, %75 : vector<8x256xf32>
    %78 = arith.mulf %68, %77 : vector<8x256xf32>
    %79 = arith.truncf %78 : vector<8x256xf32> to vector<8x256xbf16>
    %c0_40 = arith.constant 0 : index
    %c0_41 = arith.constant 0 : index
    %80 = vector.load %arg12[%c0_40, %c0_41] : memref<256x2xbf16, #tpu.memory_space<vmem>>, vector<256x2xbf16>
    %cst_42 = arith.constant dense<0.000000e+00> : vector<8x2xf32>
    %81 = tpu.matmul %79, %80, %cst_42 {dimension_numbers = #tpu.dot_dimension_numbers<[1], [0], [0], [1], [0, 0, 1, 1], [], []>} : vector<8x256xbf16>, vector<256x2xbf16>, vector<8x2xf32> -> vector<8x2xf32>
    %c0_43 = arith.constant 0 : index
    %c0_44 = arith.constant 0 : index
    %82 = vector.load %arg13[%c0_43, %c0_44] : memref<1x2xf32, #tpu.memory_space<vmem>>, vector<1x2xf32>
    %83 = vector.broadcast %82 : vector<1x2xf32> to vector<8x2xf32>
    %84 = arith.addf %81, %83 : vector<8x2xf32>
    %cst_45 = arith.constant 5.000000e-01 : f32
    %85 = vector.broadcast %cst_45 : f32 to vector<8x2xf32>
    %86 = arith.mulf %85, %84 : vector<8x2xf32>
    %87 = arith.mulf %84, %84 : vector<8x2xf32>
    %cst_46 = arith.constant 0.0356774069 : f32
    %88 = vector.broadcast %cst_46 : f32 to vector<8x2xf32>
    %89 = arith.mulf %88, %87 : vector<8x2xf32>
    %cst_47 = arith.constant 0.797884583 : f32
    %90 = vector.broadcast %cst_47 : f32 to vector<8x2xf32>
    %91 = arith.addf %90, %89 : vector<8x2xf32>
    %92 = arith.mulf %84, %91 : vector<8x2xf32>
    %93 = math.tanh %92 : vector<8x2xf32>
    %cst_48 = arith.constant 1.000000e+00 : f32
    %94 = vector.broadcast %cst_48 : f32 to vector<8x2xf32>
    %95 = arith.addf %94, %93 : vector<8x2xf32>
    %96 = arith.mulf %86, %95 : vector<8x2xf32>
    %97 = tpu.iota {dimensions = array<i32: 1>} : vector<8x2xi32>
    %c0_i32 = arith.constant 0 : i32
    %98 = vector.broadcast %c0_i32 : i32 to vector<8x2xi32>
    %99 = arith.cmpi eq, %97, %98 : vector<8x2xi32>
    %cst_49 = arith.constant 0.000000e+00 : f32
    %100 = vector.broadcast %cst_49 : f32 to vector<8x2xf32>
    %101 = arith.maximumf %96, %100 : vector<8x2xf32>
    %102 = math.absf %96 : vector<8x2xf32>
    %cst_50 = arith.constant 0.000000e+00 : f32
    %103 = vector.broadcast %cst_50 : f32 to vector<8x2xf32>
    %104 = arith.subf %103, %102 : vector<8x2xf32>
    %105 = math.exp %104 : vector<8x2xf32>
    %cst_51 = arith.constant 1.000000e+00 : f32
    %106 = vector.broadcast %cst_51 : f32 to vector<8x2xf32>
    %107 = arith.addf %106, %105 : vector<8x2xf32>
    %108 = math.log %107 : vector<8x2xf32>
    %109 = arith.addf %101, %108 : vector<8x2xf32>
    %110 = arith.select %99, %96, %109 : vector<8x2xi1>, vector<8x2xf32>
    %c0_52 = arith.constant 0 : index
    %c0_53 = arith.constant 0 : index
    %111 = vector.load %arg14[%c0_52, %c0_53] : memref<8x2xf32, #tpu.memory_space<vmem>>, vector<8x2xf32>
    tpu.vector_store %arg14[%c0_52, %c0_53], %110 {strides = array<i32>} : memref<8x2xf32, #tpu.memory_space<vmem>>, vector<8x2xf32>,
    return
  }
  func.func @transform_0(%arg0: i32) -> (i32, i32) {
    %c0_i32 = arith.constant 0 : i32
    %c0_i32_0 = arith.constant 0 : i32
    return %arg0, %c0_i32 : i32, i32
  }
  func.func @transform_1(%arg0: i32) -> (i32, i32) {
    %c0_i32 = arith.constant 0 : i32
    %c0_i32_0 = arith.constant 0 : i32
    return %arg0, %c0_i32 : i32, i32
  }
  func.func @transform_2(%arg0: i32) -> (i32, i32) {
    %c0_i32 = arith.constant 0 : i32
    %c0_i32_0 = arith.constant 0 : i32
    %c0_i32_1 = arith.constant 0 : i32
    return %c0_i32, %c0_i32_0 : i32, i32
  }
  func.func @transform_3(%arg0: i32) -> (i32, i32) {
    %c0_i32 = arith.constant 0 : i32
    %c0_i32_0 = arith.constant 0 : i32
    %c0_i32_1 = arith.constant 0 : i32
    return %c0_i32, %c0_i32_0 : i32, i32
  }
  func.func @transform_4(%arg0: i32) -> (i32, i32) {
    %c0_i32 = arith.constant 0 : i32
    %c0_i32_0 = arith.constant 0 : i32
    %c0_i32_1 = arith.constant 0 : i32
    return %c0_i32, %c0_i32_0 : i32, i32
  }
  func.func @transform_5(%arg0: i32) -> (i32, i32) {
    %c0_i32 = arith.constant 0 : i32
    %c0_i32_0 = arith.constant 0 : i32
    %c0_i32_1 = arith.constant 0 : i32
    return %c0_i32, %c0_i32_0 : i32, i32
  }
  func.func @transform_6(%arg0: i32) -> (i32, i32) {
    %c0_i32 = arith.constant 0 : i32
    %c0_i32_0 = arith.constant 0 : i32
    %c0_i32_1 = arith.constant 0 : i32
    return %c0_i32, %c0_i32_0 : i32, i32
  }
  func.func @transform_7(%arg0: i32) -> (i32, i32) {
    %c0_i32 = arith.constant 0 : i32
    %c0_i32_0 = arith.constant 0 : i32
    %c0_i32_1 = arith.constant 0 : i32
    return %c0_i32, %c0_i32_0 : i32, i32
  }
  func.func @transform_8(%arg0: i32) -> (i32, i32) {
    %c0_i32 = arith.constant 0 : i32
    %c0_i32_0 = arith.constant 0 : i32
    %c0_i32_1 = arith.constant 0 : i32
    return %c0_i32, %c0_i32_0 : i32, i32
  }
  func.func @transform_9(%arg0: i32) -> (i32, i32) {
    %c0_i32 = arith.constant 0 : i32
    %c0_i32_0 = arith.constant 0 : i32
    %c0_i32_1 = arith.constant 0 : i32
    return %c0_i32, %c0_i32_0 : i32, i32
  }
  func.func @transform_10(%arg0: i32) -> (i32, i32) {
    %c0_i32 = arith.constant 0 : i32
    %c0_i32_0 = arith.constant 0 : i32
    %c0_i32_1 = arith.constant 0 : i32
    return %c0_i32, %c0_i32_0 : i32, i32
  }
  func.func @transform_11(%arg0: i32) -> (i32, i32) {
    %c0_i32 = arith.constant 0 : i32
    %c0_i32_0 = arith.constant 0 : i32
    %c0_i32_1 = arith.constant 0 : i32
    return %c0_i32, %c0_i32_0 : i32, i32
  }
  func.func @transform_12(%arg0: i32) -> (i32, i32) {
    %c0_i32 = arith.constant 0 : i32
    %c0_i32_0 = arith.constant 0 : i32
    %c0_i32_1 = arith.constant 0 : i32
    return %c0_i32, %c0_i32_0 : i32, i32
  }
  func.func @transform_13(%arg0: i32) -> (i32, i32) {
    %c0_i32 = arith.constant 0 : i32
    %c0_i32_0 = arith.constant 0 : i32
    return %arg0, %c0_i32 : i32, i32
  }
}

</mosaic_0001>

<bundles_post_ra>
// kernel: critic_forward.1
= control target key start
LH: loop header
LB: loop body
LE: loop exit
PB: predicated region body
PF: predicated region fallthrough
CT: control target
= control target key end

     0   :  { %18 = vsyncpa [#allocation3], 0  ;;  %s1815_s0 = inlined_call_operand.vmem [shape: f32[8,16], index: 0, kind: input, shape index: {}]   ;;  %s1816_s1 = inlined_call_operand.vmem [shape: f32[8,1], index: 1, kind: input, shape index: {}]   ;;  %s1817_s2 = inlined_call_operand.vmem [shape: bf16[16,256], index: 2, kind: input, shape index: {}]   ;;  %s1818_s3 = inlined_call_operand.vmem [shape: f32[1,256], index: 3, kind: input, shape index: {}]   ;;  %s1819_s4 = inlined_call_operand.vmem [shape: f32[1,256], index: 4, kind: input, shape index: {}]   ;;  %s1820_s5 = inlined_call_operand.hbm [shape: bf16[256,256], index: 5, kind: input, shape index: {}]   ;;  %s1821_s6 = inlined_call_operand.vmem [shape: f32[1,256], index: 6, kind: input, shape index: {}]   ;;  %s1822_s7 = inlined_call_operand.hbm [shape: bf16[256,256], index: 7, kind: input, shape index: {}]   ;;  %s1823_s8 = inlined_call_operand.vmem [shape: f32[1,256], index: 8, kind: input, shape index: {}]   ;;  %s1824_s9 = inlined_call_operand.hbm [shape: bf16[256,256], index: 9, kind: input, shape index: {}]   ;;  %s1825_s10 = inlined_call_operand.vmem [shape: f32[1,256], index: 10, kind: input, shape index: {}]   ;;  %s1826_s11 = inlined_call_operand.vmem [shape: bf16[256,2], index: 11, kind: input, shape index: {}]   ;;  %s1827_s12 = inlined_call_operand.vmem [shape: f32[1,2], index: 12, kind: input, shape index: {}]   ;;  %s1828_s13 = inlined_call_operand.vmem [shape: f32[8,2], index: 13, kind: output, shape index: {}]  }
   0x1   :  { %19 = vsyncpa [#allocation5], 0  ;;  %s1590_s25 = smov [#allocation4]   ;;  %s1591_s27 = smov [#allocation2]  }
   0x2   :  { %s49_s26 = sshll.u32 %s1590_s25, 4  ;;  %s35_s28 = sshll.u32 %s1591_s27, 4  ;;  %s50_s26 = int_to_ptr.vmem [resolvable:$true] %s49_s26  ;;  %s1666_s28 = int_to_ptr.vmem [resolvable:$true] %s35_s28 }
   0x3   :  { %s1520_s14 = scalar_lea.hbm %s1822_s7, 4096 }
   0x4   :  { %p1521_p0 = scmp.ne.s32.totalorder %s1822_s7, %s1520_s14  ;;  %p1524_p1 = scmp.lt.u32.totalorder %s1520_s14, %s1822_s7 }
   0x6   :  { %p1526_p2 = pnand %p1524_p1, %p1521_p0 }
   0x8   :  { %1529 = shalt.err (!%p1526_p2)
}
   0x9   :  { %s1530_s19 = scalar_lea.vmem %s50_s26, 4096  ;;  %p1535_p4 = scmp.lt.s32.totalorder %s50_s26, %s50_s26 }
   0xa   :  { %p1531_p3 = scmp.ne.s32.totalorder %s50_s26, %s1530_s19  ;;  %p1536_p5 = scmp.lt.s32.totalorder %s1530_s19, %s1530_s19 }
   0xc   :  { %p1537_p6 = por %p1536_p5, %p1535_p4 }
   0xe   :  { %p1538_p7 = pnand %p1537_p6, %p1531_p3 }
  0x10   :  { %1541 = shalt.err (!%p1538_p7)
}
  0x11   :  { %s1592_s20 = smov 128   ;;  %s1593_s21 = smov 8  }
  0x12   :  { %55 = dma.hbm_to_vmem [thread:$0]  %s1822_s7, 4096, %s50_s26, [#allocation5], %s1592_s20, %s1592_s20, %s1593_s21  }
  0x13   :  { %s1542_s27 = scalar_lea.hbm %s1820_s5, 4096 }
  0x14   :  { %p1543_p8 = scmp.ne.s32.totalorder %s1820_s5, %s1542_s27  ;;  %p1546_p9 = scmp.lt.u32.totalorder %s1542_s27, %s1820_s5 }
  0x16   :  { %p1548_p10 = pnand %p1546_p9, %p1543_p8 }
  0x18   :  { %1551 = shalt.err (!%p1548_p10)
}
  0x19   :  { %s1552_s16 = scalar_lea.vmem %s1666_s28, 4096  ;;  %p1557_p12 = scmp.lt.s32.totalorder %s1666_s28, %s1666_s28 }
  0x1a   :  { %p1553_p11 = scmp.ne.s32.totalorder %s1666_s28, %s1552_s16  ;;  %p1558_p13 = scmp.lt.s32.totalorder %s1552_s16, %s1552_s16 }
  0x1c   :  { %p1559_p0 = por %p1558_p13, %p1557_p12 }
  0x1e   :  { %p1560_p1 = pnand %p1559_p0, %p1553_p11 }
  0x20   :  { %1563 = shalt.err (!%p1560_p1)
}
  0x21   :  { %41 = dma.hbm_to_vmem [thread:$0]  %s1820_s5, 4096, %s1666_s28, [#allocation3], %s1592_s20, %s1592_s20, %s1593_s21  }
  0x22   :  { %s1594_s17 = smov [#allocation6]   ;;  %s1564_s23 = scalar_lea.hbm %s1824_s9, 4096 }
  0x23   :  { %s63_s18 = sshll.u32 %s1594_s17, 4  ;;  %p1565_p2 = scmp.ne.s32.totalorder %s1824_s9, %s1564_s23  ;;  %s64_s18 = int_to_ptr.vmem [resolvable:$true] %s63_s18 }
  0x24   :  { %p1568_p3 = scmp.lt.u32.totalorder %s1564_s23, %s1824_s9 }
  0x26   :  { %p1570_p4 = pnand %p1568_p3, %p1565_p2 }
  0x28   :  { %1573 = shalt.err (!%p1570_p4)
}
  0x29   :  { %s1574_s30 = scalar_lea.vmem %s64_s18, 4096  ;;  %p1579_p6 = scmp.lt.s32.totalorder %s64_s18, %s64_s18 }
  0x2a   :  { %p1575_p5 = scmp.ne.s32.totalorder %s64_s18, %s1574_s30  ;;  %p1580_p7 = scmp.lt.s32.totalorder %s1574_s30, %s1574_s30 }
  0x2c   :  { %p1581_p8 = por %p1580_p7, %p1579_p6 }
  0x2e   :  { %p1582_p9 = pnand %p1581_p8, %p1575_p5 }
  0x30   :  { %1585 = shalt.err (!%p1582_p9)
}
  0x31   :  { %69 = dma.hbm_to_vmem [thread:$0]  %s1824_s9, 4096, %s64_s18, [#allocation5], %s1592_s20, %s1592_s20, %s1593_s21  }
  0x32   :  { %1586 = dma.done.wait [#allocation3], 4096  }
  0x33   :  { %1587 = vsyncadd [#allocation3], 4294963200 }
  0x34   :  { %1588 = dma.done.wait [#allocation5], 8192  }
  0x35   :  { %1589 = vsyncadd [#allocation5], 4294959104  ;;  %v1595_v0 = vmov 0   ;;  %v1335_v1 = vld [vmem:[%s1817_s2 + $0x4] ss:$8 sps:$4 sm:$0xff]   ;;  %vm120_vm0 = vcmask 130048   ;;  %v98_v56 = vlaneseq }
  0x36   :  { %156 = vmatprep.mubr.bf16.mxu0 %v1595_v0  ;;  %1334 = vset.pattern.permute.xlu0 %v1595_v0  ;;  %v1337_v2 = vld [vmem:[%s1817_s2] ss:$8 sps:$4 sm:$0xff]   ;;  %v1338_v6 = vld [vmem:[#allocation2 + $0x4] ss:$8 sps:$4 sm:$0xff]   ;;  %v1341_v8 = vld [vmem:[#allocation2 + $0x14] ss:$8 sps:$4 sm:$0xff]  }
  0x37   :  { %v86_v3 = vld [vmem:[%s1815_s0] sm:$0xff]  ;;  %124 = vmatprep.subr.bf16.mxu0 %v1335_v1  ;;  %401 = vmatprep.subr.bf16.mxu1 %v1338_v6  ;;  %v1343_v9 = vld [vmem:[#allocation2 + $0x10] ss:$8 sps:$4 sm:$0xff]   ;;  %v1347_v12 = vld [vmem:[#allocation2 + $0x34] ss:$8 sps:$4 sm:$0xff]   ;;  %v99_v57 = vshrl.u32 %v98_v56, 7 }
  0x38   :  { %v88_v4 = vld [vmem:[%s1816_s1] sm:$0xff]  ;;  %v87_v5 = vpack.c.bf16 %v86_v3, %v86_v3  ;;  %125 = vmatpush1.bf16.msra.mxu0 %v1337_v2  ;;  %v1349_v13 = vld [vmem:[#allocation2 + $0x30] ss:$8 sps:$4 sm:$0xff]   ;;  %v1353_v16 = vld [vmem:[#allocation2 + $0x54] ss:$8 sps:$4 sm:$0xff]   ;;  %vm1182_vm2 = vcmask 15360  }
  0x39   :  { %94 = vperm.xlu0 %1334, %v88_v4   ;;  %v1340_v7 = vld [vmem:[#allocation2] ss:$8 sps:$4 sm:$0xff]   ;;  %v1344_v10 = vld [vmem:[#allocation2 + $0x24] ss:$8 sps:$4 sm:$0xff]   ;;  %v1355_v17 = vld [vmem:[#allocation2 + $0x50] ss:$8 sps:$4 sm:$0xff]  }
  0x3a   :  { %402 = vmatpush1.bf16.msra.mxu1 %v1340_v7  ;;  %v1346_v11 = vld [vmem:[#allocation2 + $0x20] ss:$8 sps:$4 sm:$0xff]   ;;  %v1350_v14 = vld [vmem:[#allocation2 + $0x44] ss:$8 sps:$4 sm:$0xff]   ;;  %v1359_v20 = vld [vmem:[#allocation2 + $0x74] ss:$8 sps:$4 sm:$0xff]  }
  0x3b   :  { %1192 = vmatmul.mubr.msk.bf16.vlgmr.msra.gmra.mrb[0].mxu0 %vm120_vm0, %v87_v5  ;;  %403 = vmatprep.subr.bf16.mxu1 %v1341_v8  ;;  %v1352_v15 = vld [vmem:[#allocation2 + $0x40] ss:$8 sps:$4 sm:$0xff]   ;;  %v1356_v18 = vld [vmem:[#allocation2 + $0x64] ss:$8 sps:$4 sm:$0xff]   ;;  %v1361_v21 = vld [vmem:[#allocation2 + $0x70] ss:$8 sps:$4 sm:$0xff]  }
  0x3c   :  { %v1358_v19 = vld [vmem:[#allocation2 + $0x60] ss:$8 sps:$4 sm:$0xff]   ;;  %v1362_v22 = vld [vmem:[#allocation2 + $0x84] ss:$8 sps:$4 sm:$0xff]   ;;  %v1365_v24 = vld [vmem:[#allocation2 + $0x94] ss:$8 sps:$4 sm:$0xff]  }
  0x3d   :  { %v1364_v23 = vld [vmem:[#allocation2 + $0x80] ss:$8 sps:$4 sm:$0xff]   ;;  %v1367_v25 = vld [vmem:[#allocation2 + $0x90] ss:$8 sps:$4 sm:$0xff]   ;;  %v1368_v26 = vld [vmem:[#allocation2 + $0xa4] ss:$8 sps:$4 sm:$0xff]  }
  0x3e   :  { %404 = vmatpush1.bf16.msra.mxu1 %v1343_v9  ;;  %v1370_v27 = vld [vmem:[#allocation2 + $0xa0] ss:$8 sps:$4 sm:$0xff]   ;;  %v1371_v28 = vld [vmem:[#allocation2 + $0xb4] ss:$8 sps:$4 sm:$0xff]   ;;  %v1373_v29 = vld [vmem:[#allocation2 + $0xb0] ss:$8 sps:$4 sm:$0xff]  }
  0x3f   :  { %405 = vmatprep.subr.bf16.mxu1 %v1344_v10  ;;  %v1374_v30 = vld [vmem:[#allocation2 + $0xc4] ss:$8 sps:$4 sm:$0xff]   ;;  %v1376_v31 = vld [vmem:[#allocation2 + $0xc0] ss:$8 sps:$4 sm:$0xff]   ;;  %v1377_v32 = vld [vmem:[#allocation2 + $0xd4] ss:$8 sps:$4 sm:$0xff]  }
  0x40   :  { %v1379_v33 = vld [vmem:[#allocation2 + $0xd0] ss:$8 sps:$4 sm:$0xff]   ;;  %v1380_v34 = vld [vmem:[#allocation2 + $0xe4] ss:$8 sps:$4 sm:$0xff]   ;;  %v1382_v35 = vld [vmem:[#allocation2 + $0xe0] ss:$8 sps:$4 sm:$0xff]  }
  0x41   :  { %v1383_v36 = vld [vmem:[#allocation2 + $0xf4] ss:$8 sps:$4 sm:$0xff]   ;;  %v1385_v37 = vld [vmem:[#allocation2 + $0xf0] ss:$8 sps:$4 sm:$0xff]   ;;  %v1386_v38 = vld [vmem:[#allocation4] ss:$8 sps:$4 sm:$0xff]  }
  0x42   :  { %406 = vmatpush1.bf16.msra.mxu1 %v1346_v11  ;;  %v1388_v39 = vld [vmem:[#allocation4 + $0x4] ss:$8 sps:$4 sm:$0xff]   ;;  %v1391_v40 = vld [vmem:[#allocation4 + $0x14] ss:$8 sps:$4 sm:$0xff]   ;;  %v1389_v41 = vld [vmem:[#allocation4 + $0x10] ss:$8 sps:$4 sm:$0xff]  }
  0x43   :  { %407 = vmatprep.subr.bf16.mxu1 %v1347_v12  ;;  %664 = vmatprep.subr.bf16.mxu0 %v1388_v39  ;;  %v1394_v42 = vld [vmem:[#allocation4 + $0x24] ss:$8 sps:$4 sm:$0xff]   ;;  %v1392_v43 = vld [vmem:[#allocation4 + $0x20] ss:$8 sps:$4 sm:$0xff]   ;;  %v1397_v44 = vld [vmem:[#allocation4 + $0x34] ss:$8 sps:$4 sm:$0xff]  }
  0x44   :  { %665 = vmatpush1.bf16.msra.mxu0 %v1386_v38  ;;  %v1395_v45 = vld [vmem:[#allocation4 + $0x30] ss:$8 sps:$4 sm:$0xff]   ;;  %v1400_v46 = vld [vmem:[#allocation4 + $0x44] ss:$8 sps:$4 sm:$0xff]   ;;  %v1398_v47 = vld [vmem:[#allocation4 + $0x40] ss:$8 sps:$4 sm:$0xff]  }
  0x45   :  { %666 = vmatprep.subr.bf16.mxu0 %v1391_v40  ;;  %v1403_v48 = vld [vmem:[#allocation4 + $0x54] ss:$8 sps:$4 sm:$0xff]   ;;  %v1401_v49 = vld [vmem:[#allocation4 + $0x50] ss:$8 sps:$4 sm:$0xff]   ;;  %v1406_v50 = vld [vmem:[#allocation4 + $0x64] ss:$8 sps:$4 sm:$0xff]  }
  0x46   :  { %408 = vmatpush1.bf16.msra.mxu1 %v1349_v13  ;;  %v1404_v51 = vld [vmem:[#allocation4 + $0x60] ss:$8 sps:$4 sm:$0xff]   ;;  %v1409_v52 = vld [vmem:[#allocation4 + $0x74] ss:$8 sps:$4 sm:$0xff]   ;;  %v1407_v53 = vld [vmem:[#allocation4 + $0x70] ss:$8 sps:$4 sm:$0xff]  }
  0x47   :  { %409 = vmatprep.subr.bf16.mxu1 %v1350_v14  ;;  %v1412_v54 = vld [vmem:[#allocation4 + $0x84] ss:$8 sps:$4 sm:$0xff]   ;;  %v1410_v55 = vld [vmem:[#allocation4 + $0x80] ss:$8 sps:$4 sm:$0xff]   ;;  %v1731_v58 = vsub.s32 0, %v99_v57  ;;  %v1736_v60 = vsub.s32 1, %v99_v57 }
  0x48   :  { %667 = vmatpush1.bf16.msra.mxu0 %v1389_v41  ;;  %v91_v59 = vld [vmem:[%s1818_s3] sm:$0x3]  ;;  %v1427_v39 = vld [vmem:[#allocation4 + $0xd4] ss:$8 sps:$4 sm:$0xff]   ;;  %v1425_v40 = vld [vmem:[#allocation4 + $0xd0] ss:$8 sps:$4 sm:$0xff]  }
  0x49   :  { %668 = vmatprep.subr.bf16.mxu0 %v1394_v42  ;;  %v101_v61 = vrot.slane %v91_v59, %v1731_v58  ;;  %v105_v62 = vrot.slane %v91_v59, %v1736_v60  ;;  %v165_v0 = vld [vmem:[%s1819_s4] sm:$0x3]  ;;  %v1430_v41 = vld [vmem:[#allocation4 + $0xe4] ss:$8 sps:$4 sm:$0xff]   ;;  %v1449_v57 = vld [vmem:[#allocation6 + $0x50] ss:$8 sps:$4 sm:$0xff]  }
  0x4a   :  { %410 = vmatpush1.bf16.msra.mxu1 %v1352_v15  ;;  %v170_v3 = vrot.slane %v165_v0, %v1731_v58  ;;  %v174_v5 = vrot.slane %v165_v0, %v1736_v60  ;;  %v1422_v38 = vld [vmem:[#allocation4 + $0xc0] ss:$8 sps:$4 sm:$0xff]   ;;  %v1454_v59 = vld [vmem:[#allocation6 + $0x64] ss:$8 sps:$4 sm:$0xff]  }
  0x4b   :  { %411 = vmatprep.subr.bf16.mxu1 %v1353_v16  ;;  %v1428_v42 = vld [vmem:[#allocation4 + $0xe0] ss:$8 sps:$4 sm:$0xff]   ;;  %v1460_v0 = vld [vmem:[#allocation6 + $0x84] ss:$8 sps:$4 sm:$0xff]  }
  0x4c   :  { %669 = vmatpush1.bf16.msra.mxu0 %v1392_v43  ;;  %v1431_v43 = vld [vmem:[#allocation4 + $0xf0] ss:$8 sps:$4 sm:$0xff]  }
  0x4d   :  { %670 = vmatprep.subr.bf16.mxu0 %v1397_v44  ;;  %v1433_v44 = vld [vmem:[#allocation4 + $0xf4] ss:$8 sps:$4 sm:$0xff]  }
  0x4e   :  { %412 = vmatpush1.bf16.msra.mxu1 %v1355_v17 }
  0x4f   :  { %413 = vmatprep.subr.bf16.mxu1 %v1356_v18 }
  0x50   :  { %671 = vmatpush1.bf16.msra.mxu0 %v1395_v45  ;;  %v1434_v45 = vld [vmem:[#allocation6] ss:$8 sps:$4 sm:$0xff]  }
  0x51   :  { %672 = vmatprep.subr.bf16.mxu0 %v1400_v46  ;;  %v1436_v46 = vld [vmem:[#allocation6 + $0x4] ss:$8 sps:$4 sm:$0xff]  }
  0x52   :  { %414 = vmatpush1.bf16.msra.mxu1 %v1358_v19 }
  0x53   :  { %415 = vmatprep.subr.bf16.mxu1 %v1359_v20 }
  0x54   :  { %673 = vmatpush1.bf16.msra.mxu0 %v1398_v47  ;;  %v1439_v47 = vld [vmem:[#allocation6 + $0x14] ss:$8 sps:$4 sm:$0xff]  }
  0x55   :  { %674 = vmatprep.subr.bf16.mxu0 %v1403_v48  ;;  %v1437_v48 = vld [vmem:[#allocation6 + $0x10] ss:$8 sps:$4 sm:$0xff]  }
  0x56   :  { %416 = vmatpush1.bf16.msra.mxu1 %v1361_v21 }
  0x57   :  { %417 = vmatprep.subr.bf16.mxu1 %v1362_v22 }
  0x58   :  { %675 = vmatpush1.bf16.msra.mxu0 %v1401_v49  ;;  %v1442_v49 = vld [vmem:[#allocation6 + $0x24] ss:$8 sps:$4 sm:$0xff]  }
  0x59   :  { %676 = vmatprep.subr.bf16.mxu0 %v1406_v50  ;;  %v1440_v50 = vld [vmem:[#allocation6 + $0x20] ss:$8 sps:$4 sm:$0xff]  }
  0x5a   :  { %418 = vmatpush1.bf16.msra.mxu1 %v1364_v23 }
  0x5b   :  { %419 = vmatprep.subr.bf16.mxu1 %v1365_v24 }
  0x5c   :  { %677 = vmatpush1.bf16.msra.mxu0 %v1404_v51  ;;  %v1445_v51 = vld [vmem:[#allocation6 + $0x34] ss:$8 sps:$4 sm:$0xff]  }
  0x5d   :  { %678 = vmatprep.subr.bf16.mxu0 %v1409_v52  ;;  %v1443_v52 = vld [vmem:[#allocation6 + $0x30] ss:$8 sps:$4 sm:$0xff]  }
  0x5e   :  { %420 = vmatpush1.bf16.msra.mxu1 %v1367_v25 }
  0x5f   :  { %421 = vmatprep.subr.bf16.mxu1 %v1368_v26 }
  0x60   :  { %679 = vmatpush1.bf16.msra.mxu0 %v1407_v53  ;;  %v1448_v53 = vld [vmem:[#allocation6 + $0x44] ss:$8 sps:$4 sm:$0xff]  }
  0x61   :  { %680 = vmatprep.subr.bf16.mxu0 %v1412_v54  ;;  %v1446_v54 = vld [vmem:[#allocation6 + $0x40] ss:$8 sps:$4 sm:$0xff]  }
  0x62   :  { %422 = vmatpush1.bf16.msra.mxu1 %v1370_v27 }
  0x63   :  { %423 = vmatprep.subr.bf16.mxu1 %v1371_v28 }
  0x64   :  { %681 = vmatpush1.bf16.msra.mxu0 %v1410_v55  ;;  %v1451_v55 = vld [vmem:[#allocation6 + $0x54] ss:$8 sps:$4 sm:$0xff]  }
  0x66   :  { %424 = vmatpush1.bf16.msra.mxu1 %v1373_v29 }
  0x67   :  { %425 = vmatprep.subr.bf16.mxu1 %v1374_v30 }
  0x6a   :  { %426 = vmatpush1.bf16.msra.mxu1 %v1376_v31  ;;  %v1415_v31 = vld [vmem:[#allocation4 + $0x94] ss:$8 sps:$4 sm:$0xff]  }
  0x6b   :  { %427 = vmatprep.subr.bf16.mxu1 %v1377_v32  ;;  %v1413_v32 = vld [vmem:[#allocation4 + $0x90] ss:$8 sps:$4 sm:$0xff]   ;;  %682 = vmatprep.subr.bf16.mxu0 %v1415_v31  ;;  %v1466_v31 = vld [vmem:[#allocation6 + $0xa4] ss:$8 sps:$4 sm:$0xff]  }
  0x6c   :  { %683 = vmatpush1.bf16.msra.mxu0 %v1413_v32  ;;  %v1464_v32 = vld [vmem:[#allocation6 + $0xa0] ss:$8 sps:$4 sm:$0xff]  }
  0x6e   :  { %428 = vmatpush1.bf16.msra.mxu1 %v1379_v33  ;;  %v1418_v33 = vld [vmem:[#allocation4 + $0xa4] ss:$8 sps:$4 sm:$0xff]  }
  0x6f   :  { %429 = vmatprep.subr.bf16.mxu1 %v1380_v34  ;;  %v1416_v34 = vld [vmem:[#allocation4 + $0xa0] ss:$8 sps:$4 sm:$0xff]   ;;  %684 = vmatprep.subr.bf16.mxu0 %v1418_v33  ;;  %v1469_v33 = vld [vmem:[#allocation6 + $0xb4] ss:$8 sps:$4 sm:$0xff]  }
  0x70   :  { %685 = vmatpush1.bf16.msra.mxu0 %v1416_v34  ;;  %v1467_v34 = vld [vmem:[#allocation6 + $0xb0] ss:$8 sps:$4 sm:$0xff]  }
  0x72   :  { %430 = vmatpush1.bf16.msra.mxu1 %v1382_v35  ;;  %v1421_v35 = vld [vmem:[#allocation4 + $0xb4] ss:$8 sps:$4 sm:$0xff]  }
  0x73   :  { %431 = vmatprep.subr.bf16.mxu1 %v1383_v36  ;;  %v1419_v36 = vld [vmem:[#allocation4 + $0xb0] ss:$8 sps:$4 sm:$0xff]   ;;  %686 = vmatprep.subr.bf16.mxu0 %v1421_v35  ;;  %v1472_v35 = vld [vmem:[#allocation6 + $0xc4] ss:$8 sps:$4 sm:$0xff]  }
  0x74   :  { %687 = vmatpush1.bf16.msra.mxu0 %v1419_v36  ;;  %v1470_v36 = vld [vmem:[#allocation6 + $0xc0] ss:$8 sps:$4 sm:$0xff]  }
  0x76   :  { %432 = vmatpush1.bf16.msra.mxu1 %v1385_v37  ;;  %v1424_v37 = vld [vmem:[#allocation4 + $0xc4] ss:$8 sps:$4 sm:$0xff]  }
  0x77   :  { %688 = vmatprep.subr.bf16.mxu0 %v1424_v37  ;;  %927 = vmatprep.subr.bf16.mxu1 %v1436_v46  ;;  %v1475_v37 = vld [vmem:[#allocation6 + $0xd4] ss:$8 sps:$4 sm:$0xff]  }
  0x78   :  { %689 = vmatpush1.bf16.msra.mxu0 %v1422_v38  ;;  %v1473_v38 = vld [vmem:[#allocation6 + $0xd0] ss:$8 sps:$4 sm:$0xff]  }
  0x79   :  { %690 = vmatprep.subr.bf16.mxu0 %v1427_v39  ;;  %v1478_v39 = vld [vmem:[#allocation6 + $0xe4] ss:$8 sps:$4 sm:$0xff]  }
  0x7c   :  { %691 = vmatpush1.bf16.msra.mxu0 %v1425_v40  ;;  %v1476_v40 = vld [vmem:[#allocation6 + $0xe0] ss:$8 sps:$4 sm:$0xff]  }
  0x7d   :  { %692 = vmatprep.subr.bf16.mxu0 %v1430_v41  ;;  %v1479_v41 = vld [vmem:[#allocation6 + $0xf0] ss:$8 sps:$4 sm:$0xff]  }
  0x80   :  { %693 = vmatpush1.bf16.msra.mxu0 %v1428_v42  ;;  %v1481_v42 = vld [vmem:[#allocation6 + $0xf4] ss:$8 sps:$4 sm:$0xff]  }
  0x81   :  { %694 = vmatprep.subr.bf16.mxu0 %v1433_v44  ;;  %v1483_v44 = vld [vmem:[%s1826_s11] sm:$0xff]  }
  0x84   :  { %695 = vmatpush1.bf16.msra.mxu0 %v1431_v43  ;;  %v1482_v43 = vld [vmem:[%s1826_s11 + $0x40] sm:$0xff]  }
  0x85   :  { %1306 = vmatprep.subr.bf16.mxu0 %v1482_v43 }
  0xb8   :  { %v95_v63 = vpop.permute.xlu0 %94 }
  0xb9   :  { %v108_v1 = vmul.f32 %v101_v61, %v95_v63  ;;  %v109_v2 = vmul.f32 %v105_v62, %v95_v63  ;;  %v1452_v61 = vld [vmem:[#allocation6 + $0x60] ss:$8 sps:$4 sm:$0xff]   ;;  %v1457_v62 = vld [vmem:[#allocation6 + $0x74] ss:$8 sps:$4 sm:$0xff]   ;;  %v1455_v63 = vld [vmem:[#allocation6 + $0x70] ss:$8 sps:$4 sm:$0xff]  }
 0x10e   :  { %v158_v4 = vpop.f32.mrb[0].mxu0 }
 0x10f   :  { %v159_v6 = vadd.f32 %v158_v4, %v108_v1  ;;  %v160_v7 = vpop.f32.mrb[1].mxu0  ;;  %v1458_v1 = vld [vmem:[#allocation6 + $0x80] ss:$8 sps:$4 sm:$0xff]  }
 0x110   :  { %v161_v8 = vadd.f32 %v160_v7, %v109_v2  ;;  %v162_v9 = vpop.f32.mrb[2].mxu0  ;;  %v229_v2 = vld [vmem:[%s1821_s6] sm:$0x3] }
 0x111   :  { %v177_v10 = vadd.f32 %v170_v3, %v159_v6  ;;  %v163_v11 = vpop.f32.mrb[3].mxu0  ;;  %v234_v3 = vrot.slane %v229_v2, %v1731_v58  ;;  %v238_v4 = vrot.slane %v229_v2, %v1736_v60 }
 0x112   :  { %v178_v12 = vadd.f32 %v174_v5, %v161_v8 }
 0x113   :  { %v181_v13 = vmul.f32 %v177_v10, %v177_v10  ;;  %v179_v23 = vmul.f32 0.5, %v177_v10 }
 0x114   :  { %v182_v14 = vmul.f32 %v178_v12, %v178_v12  ;;  %v180_v25 = vmul.f32 0.5, %v178_v12 }
 0x115   :  { %v183_v15 = vmul.f32 0.035677407, %v181_v13 }
 0x116   :  { %v184_v16 = vmul.f32 0.035677407, %v182_v14 }
 0x117   :  { %v185_v17 = vadd.f32 0.7978846, %v183_v15 }
 0x118   :  { %v186_v18 = vadd.f32 0.7978846, %v184_v16 }
 0x119   :  { %v187_v19 = vmul.f32 %v185_v17, %v177_v10 }
 0x11a   :  { %v188_v20 = vmul.f32 %v186_v18, %v178_v12 }
 0x11b   :  { %1498 = vtanh.f32 %v187_v19 }
 0x11c   :  { %1500 = vtanh.f32 %v188_v20 }
 0x125   :  { %v1499_v21 = vpop.eup %1498 }
 0x126   :  { %v1501_v22 = vpop.eup %1500  ;;  %v191_v24 = vadd.f32 1.0, %v1499_v21 }
 0x127   :  { %v192_v26 = vadd.f32 1.0, %v1501_v22 }
 0x128   :  { %v193_v27 = vmul.f32 %v191_v24, %v179_v23 }
 0x129   :  { %v194_v28 = vmul.f32 %v192_v26, %v180_v25 }
 0x12a   :  { %v195_v30 = vpack.c.bf16 %v193_v27, %v193_v27 }
 0x12b   :  { %v196_v29 = vpack.c.bf16 %v194_v28, %v194_v28 }
 0x12d   :  { %433 = vmatprep.mubr.bf16.mxu1 %v196_v29  ;;  %v1463_v29 = vld [vmem:[#allocation6 + $0x94] ss:$8 sps:$4 sm:$0xff]  }
 0x12e   :  { %434 = vmatmul.mubr.bf16.vlgmr.msra.gmra.mrb[0].mxu1 %v195_v30  ;;  %v1461_v30 = vld [vmem:[#allocation6 + $0x90] ss:$8 sps:$4 sm:$0xff]  }
 0x12f   :  { %928 = vmatpush1.bf16.msra.mxu1 %v1434_v45  ;;  %v492_v45 = vld [vmem:[%s1823_s8] sm:$0x3] }
 0x130   :  { %929 = vmatprep.subr.bf16.mxu1 %v1439_v47  ;;  %v497_v46 = vrot.slane %v492_v45, %v1731_v58  ;;  %v501_v47 = vrot.slane %v492_v45, %v1736_v60 }
 0x133   :  { %930 = vmatpush1.bf16.msra.mxu1 %v1437_v48 }
 0x134   :  { %931 = vmatprep.subr.bf16.mxu1 %v1442_v49 }
 0x137   :  { %932 = vmatpush1.bf16.msra.mxu1 %v1440_v50 }
 0x138   :  { %933 = vmatprep.subr.bf16.mxu1 %v1445_v51 }
 0x13b   :  { %934 = vmatpush1.bf16.msra.mxu1 %v1443_v52 }
 0x13c   :  { %935 = vmatprep.subr.bf16.mxu1 %v1448_v53 }
 0x13f   :  { %936 = vmatpush1.bf16.msra.mxu1 %v1446_v54 }
 0x140   :  { %937 = vmatprep.subr.bf16.mxu1 %v1451_v55 }
 0x143   :  { %938 = vmatpush1.bf16.msra.mxu1 %v1449_v57 }
 0x144   :  { %939 = vmatprep.subr.bf16.mxu1 %v1454_v59 }
 0x147   :  { %940 = vmatpush1.bf16.msra.mxu1 %v1452_v61 }
 0x148   :  { %941 = vmatprep.subr.bf16.mxu1 %v1457_v62 }
 0x14b   :  { %942 = vmatpush1.bf16.msra.mxu1 %v1455_v63 }
 0x14c   :  { %943 = vmatprep.subr.bf16.mxu1 %v1460_v0 }
 0x14f   :  { %944 = vmatpush1.bf16.msra.mxu1 %v1458_v1 }
 0x150   :  { %945 = vmatprep.subr.bf16.mxu1 %v1463_v29 }
 0x153   :  { %946 = vmatpush1.bf16.msra.mxu1 %v1461_v30 }
 0x154   :  { %947 = vmatprep.subr.bf16.mxu1 %v1466_v31 }
 0x157   :  { %948 = vmatpush1.bf16.msra.mxu1 %v1464_v32 }
 0x158   :  { %949 = vmatprep.subr.bf16.mxu1 %v1469_v33 }
 0x15b   :  { %950 = vmatpush1.bf16.msra.mxu1 %v1467_v34 }
 0x15c   :  { %951 = vmatprep.subr.bf16.mxu1 %v1472_v35 }
 0x15f   :  { %952 = vmatpush1.bf16.msra.mxu1 %v1470_v36 }
 0x160   :  { %953 = vmatprep.subr.bf16.mxu1 %v1475_v37 }
 0x163   :  { %954 = vmatpush1.bf16.msra.mxu1 %v1473_v38 }
 0x164   :  { %955 = vmatprep.subr.bf16.mxu1 %v1478_v39 }
 0x167   :  { %956 = vmatpush1.bf16.msra.mxu1 %v1476_v40 }
 0x168   :  { %957 = vmatprep.subr.bf16.mxu1 %v1481_v42 }
 0x16b   :  { %958 = vmatpush1.bf16.msra.mxu1 %v1479_v41 }
 0x201   :  { %v435_v5 = vpop.f32.mrb[0].mxu1 }
 0x202   :  { %v436_v6 = vadd.f32 %v435_v5, %v234_v3  ;;  %v437_v7 = vpop.f32.mrb[1].mxu1 }
 0x203   :  { %v438_v8 = vadd.f32 %v437_v7, %v238_v4  ;;  %v439_v9 = vpop.f32.mrb[2].mxu1 }
 0x204   :  { %v444_v10 = vmul.f32 %v436_v6, %v436_v6  ;;  %v440_v11 = vpop.f32.mrb[3].mxu1  ;;  %v442_v21 = vmul.f32 0.5, %v436_v6 }
 0x205   :  { %v445_v12 = vmul.f32 %v438_v8, %v438_v8  ;;  %v443_v23 = vmul.f32 0.5, %v438_v8  ;;  %v1484_v11 = vld [vmem:[%s1826_s11 + $0x48] sm:$0xff]  }
 0x206   :  { %v446_v13 = vmul.f32 0.035677407, %v444_v10 }
 0x207   :  { %v447_v14 = vmul.f32 0.035677407, %v445_v12  ;;  %v1485_v12 = vld [vmem:[%s1826_s11 + $0x8] sm:$0xff]  }
 0x208   :  { %v448_v15 = vadd.f32 0.7978846, %v446_v13  ;;  %v1486_v13 = vld [vmem:[%s1826_s11 + $0x50] sm:$0xff]  }
 0x209   :  { %v449_v16 = vadd.f32 0.7978846, %v447_v14  ;;  %v1487_v14 = vld [vmem:[%s1826_s11 + $0x10] sm:$0xff]  }
 0x20a   :  { %v450_v17 = vmul.f32 %v448_v15, %v436_v6  ;;  %v1488_v15 = vld [vmem:[%s1826_s11 + $0x58] sm:$0xff]  }
 0x20b   :  { %v451_v18 = vmul.f32 %v449_v16, %v438_v8  ;;  %v1489_v16 = vld [vmem:[%s1826_s11 + $0x18] sm:$0xff]  }
 0x20c   :  { %1502 = vtanh.f32 %v450_v17  ;;  %v1490_v17 = vld [vmem:[%s1826_s11 + $0x60] sm:$0xff]  }
 0x20d   :  { %1504 = vtanh.f32 %v451_v18  ;;  %v1491_v18 = vld [vmem:[%s1826_s11 + $0x20] sm:$0xff]  }
 0x216   :  { %v1503_v19 = vpop.eup %1502 }
 0x217   :  { %v1505_v20 = vpop.eup %1504  ;;  %v454_v22 = vadd.f32 1.0, %v1503_v19  ;;  %v1492_v19 = vld [vmem:[%s1826_s11 + $0x68] sm:$0xff]  }
 0x218   :  { %v455_v24 = vadd.f32 1.0, %v1505_v20  ;;  %v1493_v20 = vld [vmem:[%s1826_s11 + $0x28] sm:$0xff]  }
 0x219   :  { %v456_v25 = vmul.f32 %v454_v22, %v442_v21  ;;  %v1494_v21 = vld [vmem:[%s1826_s11 + $0x70] sm:$0xff]  }
 0x21a   :  { %v457_v26 = vmul.f32 %v455_v24, %v443_v23  ;;  %v1495_v22 = vld [vmem:[%s1826_s11 + $0x30] sm:$0xff]   ;;  %v1496_v23 = vld [vmem:[%s1826_s11 + $0x78] sm:$0xff]  }
 0x21b   :  { %v458_v28 = vpack.c.bf16 %v456_v25, %v456_v25  ;;  %v1497_v24 = vld [vmem:[%s1826_s11 + $0x38] sm:$0xff]   ;;  %v755_v25 = vld [vmem:[%s1825_s10] sm:$0x3] }
 0x21c   :  { %v459_v27 = vpack.c.bf16 %v457_v26, %v457_v26  ;;  %v760_v26 = vrot.slane %v755_v25, %v1731_v58 }
 0x21e   :  { %696 = vmatprep.mubr.bf16.mxu0 %v459_v27  ;;  %v764_v27 = vrot.slane %v755_v25, %v1736_v60 }
 0x21f   :  { %697 = vmatmul.mubr.bf16.vlgmr.msra.gmra.mrb[4].mxu0 %v458_v28 }
 0x220   :  { %1307 = vmatpush3.bf16.msra.mxu0 %v1483_v44 }
 0x221   :  { %1308 = vmatprep.subr.bf16.mxu0 %v1484_v11 }
 0x224   :  { %1309 = vmatpush3.bf16.msra.mxu0 %v1485_v12 }
 0x225   :  { %1310 = vmatprep.subr.bf16.mxu0 %v1486_v13 }
 0x228   :  { %1311 = vmatpush3.bf16.msra.mxu0 %v1487_v14 }
 0x229   :  { %1312 = vmatprep.subr.bf16.mxu0 %v1488_v15 }
 0x22c   :  { %1313 = vmatpush3.bf16.msra.mxu0 %v1489_v16 }
 0x22d   :  { %1314 = vmatprep.subr.bf16.mxu0 %v1490_v17 }
 0x230   :  { %1315 = vmatpush3.bf16.msra.mxu0 %v1491_v18 }
 0x231   :  { %1316 = vmatprep.subr.bf16.mxu0 %v1492_v19 }
 0x234   :  { %1317 = vmatpush3.bf16.msra.mxu0 %v1493_v20 }
 0x235   :  { %1318 = vmatprep.subr.bf16.mxu0 %v1494_v21 }
 0x238   :  { %1319 = vmatpush3.bf16.msra.mxu0 %v1495_v22 }
 0x239   :  { %1320 = vmatprep.subr.bf16.mxu0 %v1496_v23 }
 0x23c   :  { %1321 = vmatpush3.bf16.msra.mxu0 %v1497_v24 }
 0x2f2   :  { %v698_v48 = vpop.f32.mrb[4].mxu0 }
 0x2f3   :  { %v699_v49 = vadd.f32 %v698_v48, %v497_v46  ;;  %v700_v50 = vpop.f32.mrb[5].mxu0 }
 0x2f4   :  { %v701_v51 = vadd.f32 %v700_v50, %v501_v47  ;;  %v702_v52 = vpop.f32.mrb[6].mxu0 }
 0x2f5   :  { %v707_v53 = vmul.f32 %v699_v49, %v699_v49  ;;  %v703_v54 = vpop.f32.mrb[7].mxu0  ;;  %v705_v3 = vmul.f32 0.5, %v699_v49 }
 0x2f6   :  { %v708_v55 = vmul.f32 %v701_v51, %v701_v51  ;;  %v706_v5 = vmul.f32 0.5, %v701_v51 }
 0x2f7   :  { %v709_v57 = vmul.f32 0.035677407, %v707_v53 }
 0x2f8   :  { %v710_v59 = vmul.f32 0.035677407, %v708_v55 }
 0x2f9   :  { %v711_v61 = vadd.f32 0.7978846, %v709_v57 }
 0x2fa   :  { %v712_v62 = vadd.f32 0.7978846, %v710_v59 }
 0x2fb   :  { %v713_v63 = vmul.f32 %v711_v61, %v699_v49 }
 0x2fc   :  { %v714_v0 = vmul.f32 %v712_v62, %v701_v51  ;;  %v1289_v51 = vld [vmem:[%s1827_s12] ss:$0 sm:$0xff] }
 0x2fd   :  { %1506 = vtanh.f32 %v713_v63 }
 0x2fe   :  { %1508 = vtanh.f32 %v714_v0 }
 0x307   :  { %v1507_v1 = vpop.eup %1506 }
 0x308   :  { %v1509_v2 = vpop.eup %1508  ;;  %v717_v4 = vadd.f32 1.0, %v1507_v1 }
 0x309   :  { %v718_v6 = vadd.f32 1.0, %v1509_v2 }
 0x30a   :  { %v719_v7 = vmul.f32 %v717_v4, %v705_v3 }
 0x30b   :  { %v720_v8 = vmul.f32 %v718_v6, %v706_v5 }
 0x30c   :  { %v721_v10 = vpack.c.bf16 %v719_v7, %v719_v7 }
 0x30d   :  { %v722_v9 = vpack.c.bf16 %v720_v8, %v720_v8 }
 0x30f   :  { %959 = vmatprep.mubr.bf16.mxu1 %v722_v9  ;;  %v1170_v9 = vand.u32 127, %v98_v56 }
 0x310   :  { %960 = vmatmul.mubr.bf16.vlgmr.msra.gmra.mrb[4].mxu1 %v721_v10 }
 0x311   :  { %vm1171_vm1 = vcmp.eq.s32.totalorder %v1170_v9, 0 }
 0x3e3   :  { %v961_v28 = vpop.f32.mrb[4].mxu1 }
 0x3e4   :  { %v962_v29 = vadd.f32 %v961_v28, %v760_v26  ;;  %v963_v30 = vpop.f32.mrb[5].mxu1 }
 0x3e5   :  { %v964_v31 = vadd.f32 %v963_v30, %v764_v27  ;;  %v965_v32 = vpop.f32.mrb[6].mxu1 }
 0x3e6   :  { %v970_v33 = vmul.f32 %v962_v29, %v962_v29  ;;  %v966_v34 = vpop.f32.mrb[7].mxu1  ;;  %v968_v43 = vmul.f32 0.5, %v962_v29 }
 0x3e7   :  { %v971_v35 = vmul.f32 %v964_v31, %v964_v31  ;;  %v969_v44 = vmul.f32 0.5, %v964_v31 }
 0x3e8   :  { %v972_v36 = vmul.f32 0.035677407, %v970_v33 }
 0x3e9   :  { %v973_v37 = vmul.f32 0.035677407, %v971_v35 }
 0x3ea   :  { %v974_v38 = vadd.f32 0.7978846, %v972_v36 }
 0x3eb   :  { %v975_v39 = vadd.f32 0.7978846, %v973_v37 }
 0x3ec   :  { %v976_v40 = vmul.f32 %v974_v38, %v962_v29 }
 0x3ed   :  { %v977_v41 = vmul.f32 %v975_v39, %v964_v31 }
 0x3ee   :  { %1510 = vtanh.f32 %v976_v40 }
 0x3ef   :  { %1512 = vtanh.f32 %v977_v41 }
 0x3f8   :  { %v1511_v42 = vpop.eup %1510 }
 0x3f9   :  { %v1513_v58 = vpop.eup %1512  ;;  %v980_v60 = vadd.f32 1.0, %v1511_v42 }
 0x3fa   :  { %v981_v45 = vadd.f32 1.0, %v1513_v58 }
 0x3fb   :  { %v982_v46 = vmul.f32 %v980_v60, %v968_v43 }
 0x3fc   :  { %v983_v47 = vmul.f32 %v981_v45, %v969_v44 }
 0x3fd   :  { %v984_v49 = vpack.c.bf16 %v982_v46, %v982_v46 }
 0x3fe   :  { %v985_v48 = vpack.c.bf16 %v983_v47, %v983_v47 }
 0x400   :  { %1153 = vmatprep.mubr.bf16.mxu0 %v985_v48 }
 0x401   :  { %1154 = vmatmul.mubr.bf16.vlgmr.msra.gmra.mrb[8].mxu0 %v984_v49 }
 0x4d4   :  { %v1322_v50 = vpop.f32.mrb[8].mxu0 }
 0x4d5   :  { %v1323_v52 = vpop.f32.mrb[9].mxu0 }
 0x4d6   :  { %v1324_v53 = vadd.f32 %v1323_v52, %v1322_v50  ;;  %v1325_v54 = vpop.f32.mrb[10].mxu0 }
 0x4d7   :  { %v1326_v55 = vpop.f32.mrb[11].mxu0 }
 0x4d8   :  { %v1156_v57 = vadd.f32 %v1324_v53, %v1289_v51 }
 0x4da   :  { %v1162_v59 = vmul.f32 %v1156_v57, %v1156_v57  ;;  %v1161_v1 = vmul.f32 0.5, %v1156_v57 }
 0x4dc   :  { %v1163_v61 = vmul.f32 0.035677407, %v1162_v59 }
 0x4de   :  { %v1164_v62 = vadd.f32 0.7978846, %v1163_v61 }
 0x4e0   :  { %v1165_v63 = vmul.f32 %v1164_v62, %v1156_v57 }
 0x4e2   :  { %1514 = vtanh.f32 %v1165_v63 }
 0x4ec   :  { %v1515_v0 = vpop.eup %1514 }
 0x4ed   :  { %v1167_v2 = vadd.f32 1.0, %v1515_v0 }
 0x4ef   :  { %v1168_v3 = vmul.f32 %v1167_v2, %v1161_v1 }
 0x4f1   :  { %v1173_v4 = vand.u32 2147483647, %v1168_v3  ;;  %v1172_v11 = vmax.f32 %v1168_v3, 0.0 }
 0x4f3   :  { %v1174_v5 = vsub.f32 0.0, %v1173_v4 }
 0x4f5   :  { %v1175_v6 = vmul.f32 1.442695, %v1174_v5 }
 0x4f7   :  { %1516 = vpow2.f32 %v1175_v6 }
 0x501   :  { %v1517_v7 = vpop.eup %1516 }
 0x502   :  { %v1177_v8 = vadd.f32 1.0, %v1517_v7 }
 0x504   :  { %1518 = vlog2.f32 %v1177_v8 }
 0x50e   :  { %v1519_v10 = vpop.eup %1518 }
 0x50f   :  { %v1179_v12 = vmul.f32 0.6931472, %v1519_v10 }
 0x511   :  { %v1180_v13 = vadd.f32 %v1179_v12, %v1172_v11 }
 0x513   :  { %v1181_v14 = vsel %vm1171_vm1, %v1168_v3, %v1180_v13 }
 0x514   :  { %1183 = vst.msk [vmem:[%s1828_s13] sm:$0xff] %vm1182_vm2, %v1181_v14 }
 0x515   :  { %1188 = vsyncpa [#allocation3], 1 }
 0x516   :  { %1189 = vsyncpa [#allocation5], 1 }

</bundles_post_ra>
